<compile_context>
chip_gen: v7x
topology: tpu7x:2x2x1
jax: 0.10.0
libtpu: 0.0.40
codegen_flags: <defaults>
</compile_context>

<pallas_src>
import functools

import jax
import jax.numpy as jnp
from jax.experimental import pallas as pl
from jax.experimental.pallas import tpu as pltpu

KEY_OUTPUT = "metric_depth"
_ALPHA = 1e-7                      # log epsilon from the module
_TARGET_BLOCK_BYTES = 1 << 20      # ~1 MiB of f32 per input per grid step


def _extract_key(prediction, key):
    if isinstance(prediction, dict):
        return prediction[key]
    return prediction


# ----------------------------- Pallas kernel --------------------------------
def _silog_partial_kernel(n_rows, has_mask, *refs):
    """Per-block partial sums for the SILog statistics.

    Each grid step reads a (BR, W) tile of prediction / target (+ optional
    mask), computes g = log(pred + a) - log(target + a) on valid pixels and
    writes [sum(g), sum(g^2), count] into its own lane-dense (8, 128) output
    slab; grid steps are fully independent ("parallel").
    """
    if has_mask:
        x_ref, t_ref, m_ref, o_ref = refs
    else:
        x_ref, t_ref, o_ref = refs
        m_ref = None

    i = pl.program_id(0)
    x = x_ref[...].astype(jnp.float32)        # (BR, W) prediction
    t = t_ref[...].astype(jnp.float32)        # (BR, W) target depth

    br = x.shape[0]
    row_idx = jax.lax.broadcasted_iota(jnp.int32, x.shape, 0) + i * br
    valid = row_idx < n_rows                  # mask the ragged last block
    if m_ref is not None:
        valid = valid & (m_ref[...] != 0)

    # where-select keeps any NaN/inf from garbage tail values out of the sums
    g = jnp.where(valid, jnp.log(x + _ALPHA) - jnp.log(t + _ALPHA), 0.0)

    s = jnp.sum(g, keepdims=True)                              # (1, 1)
    s2 = jnp.sum(g * g, keepdims=True)                         # (1, 1)
    c = jnp.sum(valid.astype(jnp.float32), keepdims=True)      # (1, 1)

    r = jax.lax.broadcasted_iota(jnp.int32, (8, 128), 0)
    o_ref[...] = jnp.where(r == 0, s,
                 jnp.where(r == 1, s2,
                 jnp.where(r == 2, c, 0.0)))


# ----------------------------- JAX glue --------------------------------------
def _pick_block_rows(n_rows, w):
    """Rows per block: ~1 MiB of f32 per input, 8-aligned or the full extent."""
    target = max(1, _TARGET_BLOCK_BYTES // (4 * w))
    if target >= n_rows:
        return n_rows
    return min(max(8, (target // 8) * 8), n_rows)


def _resize_bilinear_align_corners(x, size):
    """NCHW bilinear resize with align_corners=True (separable, 2 passes)."""
    N, C, H, W = x.shape
    Ho, Wo = size
    if (H, W) == (Ho, Wo):
        return x

    def _coords(n_in, n_out):
        if n_out == 1:
            pos = jnp.zeros((n_out,), jnp.float32)
        else:
            pos = jnp.linspace(0.0, float(n_in - 1), n_out)
        lo = jnp.clip(jnp.floor(pos).astype(jnp.int32), 0, n_in - 1)
        hi = jnp.minimum(lo + 1, n_in - 1)
        wt = pos - lo.astype(jnp.float32)
        return lo, hi, wt

    y0, y1, wy = _coords(H, Ho)
    x0, x1, wx = _coords(W, Wo)
    xr = (jnp.take(x, y0, axis=2) * (1.0 - wy)[None, None, :, None]
          + jnp.take(x, y1, axis=2) * wy[None, None, :, None])
    return (jnp.take(xr, x0, axis=3) * (1.0 - wx)[None, None, None, :]
            + jnp.take(xr, x1, axis=3) * wx[None, None, None, :])


def silog_loss(prediction, target, mask=None, *, beta=0.15,
               interpolate=True, return_interpolated=False):
    """Forward of SILogLoss: 10 * sqrt(var(g) + beta * mean(g)^2),
    g = log(pred + 1e-7) - log(target + 1e-7) over (optionally masked) pixels.
    prediction: (N,1,H,W) (or dict with 'metric_depth'); target: (N,H,W) or
    (N,1,H,W); mask: optional (N,H,W) / (N,1,H,W)."""
    pred = _extract_key(prediction, KEY_OUTPUT)
    if pred.shape[-1] != target.shape[-1] and interpolate:
        pred = _resize_bilinear_align_corners(pred, target.shape[-2:])
    intr_input = pred

    if target.ndim == 3:
        target = target[:, None]
    if pred.ndim == 3:
        pred = pred[:, None]
    assert pred.shape[1] == 1, "SILog expects a single metric-depth channel"

    N, _, H, W = pred.shape
    NH = N * H

    # Metadata-only reshapes: no wrapper-side cast / pad / copy of the inputs.
    x = pred.reshape(NH, W)
    t = target.reshape(NH, W)

    has_mask = mask is not None
    ins = [x, t]
    if has_mask:
        if mask.ndim == 3:
            mask = mask[:, None]
        m = mask.reshape(NH, W)
        if m.dtype == jnp.bool_:
            m = m.astype(jnp.int32)
        ins.append(m)

    br = _pick_block_rows(NH, W)
    g_steps = pl.cdiv(NH, br)
    grid = (g_steps,)

    in_specs = [pl.BlockSpec((br, W), lambda i: (i, 0)) for _ in ins]
    kernel = functools.partial(_silog_partial_kernel, NH, has_mask)

    partials = pl.pallas_call(
        kernel,
        out_shape=jax.ShapeDtypeStruct((g_steps * 8, 128), jnp.float32),
        grid_spec=pltpu.PrefetchScalarGridSpec(
            num_scalar_prefetch=0,
            grid=grid,
            in_specs=in_specs,
            out_specs=pl.BlockSpec((8, 128), lambda i: (i, 0)),
        ),
        compiler_params=pltpu.CompilerParams(
            dimension_semantics=("parallel",),
            vmem_limit_bytes=32 * 1024 * 1024,
        ),
    )(*ins)

    # Tiny epilogue in plain JAX (G x 3 values).
    parts = partials.reshape(g_steps, 8, 128)[:, :3, 0]
    s = jnp.sum(parts[:, 0])
    s2 = jnp.sum(parts[:, 1])
    c = jnp.sum(parts[:, 2])

    mean_g = s / c
    var_g = (s2 - s * s / c) / (c - 1.0)       # unbiased, matches torch.var()
    dg = var_g + beta * mean_g * mean_g
    loss = 10.0 * jnp.sqrt(dg)
    # torch path: empty masked selection -> loss = mean(hack_input) * 0 == 0
    # TODO(synk): NaN-debug printing branch of the module is host-side only.
    loss = jnp.where(c > 0, loss, jnp.float32(0.0))

    if return_interpolated:
        return loss, intr_input
    return loss


# ----------------------------- reference (plain JAX) -------------------------
def _reference_silog(pred, target, mask=None, beta=0.15):
    if target.ndim == 3:
        target = target[:, None]
    p = jnp.ravel(pred).astype(jnp.float32)
    t = jnp.ravel(target).astype(jnp.float32)
    if mask is not None:
        if mask.ndim == 3:
            mask = mask[:, None]
        m = jnp.ravel(mask).astype(bool)
        p = p[m]          # eager boolean indexing (reference is not jitted)
        t = t[m]
    g = jnp.log(p + 1e-7) - jnp.log(t + 1e-7)
    dg = jnp.var(g, ddof=1) + beta * jnp.mean(g) ** 2
    return 10.0 * jnp.sqrt(dg)


if __name__ == "__main__":
    key = jax.random.PRNGKey(0)
    k1, k2, k3 = jax.random.split(key, 3)

    N, H, W = 2, 16, 16
    pred = jax.random.uniform(k1, (N, 1, H, W), minval=0.1, maxval=10.0,
                              dtype=jnp.float32)
    target = jax.random.uniform(k2, (N, H, W), minval=0.1, maxval=10.0,
                                dtype=jnp.float32)
    mask = (jax.random.uniform(k3, (N, H, W)) > 0.2).astype(jnp.int32)

    loss = jax.block_until_ready(silog_loss(pred, target, mask))
    ref = jax.block_until_ready(_reference_silog(pred, target, mask))

    assert jnp.isfinite(loss), "non-finite loss"
    assert abs(float(loss) - float(ref)) < 1e-3 * max(1.0, abs(float(ref))), (
        float(loss), float(ref))
    print("KERNEL_OK")
</pallas_src>

<mosaic_0001>
module attributes {stable_mosaic.version = 11 : i64} {
  func.func @_silog_partial_kernel(%arg0: i32, %arg1: memref<32x16xf32, #tpu.memory_space<vmem>>, %arg2: memref<32x16xf32, #tpu.memory_space<vmem>>, %arg3: memref<32x16xi32, #tpu.memory_space<vmem>>, %arg4: memref<8x128xf32, #tpu.memory_space<vmem>>) attributes {dimension_semantics = [#tpu.dimension_semantics<parallel>], iteration_bounds = array<i64: 1>, scalar_prefetch = 0 : i64, scratch_operands = 0 : i64, tpu.core_type = #tpu.core_type<tc>, window_params = [{transform_indices = @transform_0, window_bounds = array<i64: 32, 16>}, {transform_indices = @transform_1, window_bounds = array<i64: 32, 16>}, {transform_indices = @transform_2, window_bounds = array<i64: 32, 16>}, {transform_indices = @transform_3, window_bounds = array<i64: 8, 128>}]} {
    %c0 = arith.constant 0 : index
    %c0_0 = arith.constant 0 : index
    %0 = vector.load %arg1[%c0, %c0_0] : memref<32x16xf32, #tpu.memory_space<vmem>>, vector<32x16xf32>
    %c0_1 = arith.constant 0 : index
    %c0_2 = arith.constant 0 : index
    %1 = vector.load %arg2[%c0_1, %c0_2] : memref<32x16xf32, #tpu.memory_space<vmem>>, vector<32x16xf32>
    %2 = tpu.iota {dimensions = array<i32: 0>} : vector<32x16xi32>
    %c32_i32 = arith.constant 32 : i32
    %3 = arith.muli %arg0, %c32_i32 : i32
    %4 = vector.broadcast %3 : i32 to vector<32x16xi32>
    %5 = arith.addi %2, %4 : vector<32x16xi32>
    %c32_i32_3 = arith.constant 32 : i32
    %6 = vector.broadcast %c32_i32_3 : i32 to vector<32x16xi32>
    %7 = arith.cmpi slt, %5, %6 : vector<32x16xi32>
    %c0_4 = arith.constant 0 : index
    %c0_5 = arith.constant 0 : index
    %8 = vector.load %arg3[%c0_4, %c0_5] : memref<32x16xi32, #tpu.memory_space<vmem>>, vector<32x16xi32>
    %c0_i32 = arith.constant 0 : i32
    %9 = vector.broadcast %c0_i32 : i32 to vector<32x16xi32>
    %10 = arith.cmpi ne, %8, %9 : vector<32x16xi32>
    %11 = arith.andi %7, %10 : vector<32x16xi1>
    %cst = arith.constant 1.000000e-07 : f32
    %12 = vector.broadcast %cst : f32 to vector<32x16xf32>
    %13 = arith.addf %0, %12 : vector<32x16xf32>
    %14 = math.log %13 : vector<32x16xf32>
    %cst_6 = arith.constant 1.000000e-07 : f32
    %15 = vector.broadcast %cst_6 : f32 to vector<32x16xf32>
    %16 = arith.addf %1, %15 : vector<32x16xf32>
    %17 = math.log %16 : vector<32x16xf32>
    %18 = arith.subf %14, %17 : vector<32x16xf32>
    %cst_7 = arith.constant 0.000000e+00 : f32
    %19 = vector.broadcast %cst_7 : f32 to vector<32x16xf32>
    %20 = arith.select %11, %18, %19 : vector<32x16xi1>, vector<32x16xf32>
    %21 = vector.shape_cast %20 : vector<32x16xf32> to vector<1x32x16xf32>
    %cst_8 = arith.constant dense<0.000000e+00> : vector<1xf32>
    %22 = vector.multi_reduction <add>, %21, %cst_8 [1, 2] : vector<1x32x16xf32> to vector<1xf32>
    %23 = vector.shape_cast %22 : vector<1xf32> to vector<1x1x1xf32>
    %24 = vector.extract %23[0, 0, 0] : f32 from vector<1x1x1xf32>
    %25 = vector.broadcast %24 : f32 to vector<1x1xf32>
    %26 = arith.mulf %20, %20 : vector<32x16xf32>
    %27 = vector.shape_cast %26 : vector<32x16xf32> to vector<1x32x16xf32>
    %cst_9 = arith.constant dense<0.000000e+00> : vector<1xf32>
    %28 = vector.multi_reduction <add>, %27, %cst_9 [1, 2] : vector<1x32x16xf32> to vector<1xf32>
    %29 = vector.shape_cast %28 : vector<1xf32> to vector<1x1x1xf32>
    %30 = vector.extract %29[0, 0, 0] : f32 from vector<1x1x1xf32>
    %31 = vector.broadcast %30 : f32 to vector<1x1xf32>
    %32 = arith.extui %11 : vector<32x16xi1> to vector<32x16xi32>
    %33 = arith.sitofp %32 : vector<32x16xi32> to vector<32x16xf32>
    %34 = vector.shape_cast %33 : vector<32x16xf32> to vector<1x32x16xf32>
    %cst_10 = arith.constant dense<0.000000e+00> : vector<1xf32>
    %35 = vector.multi_reduction <add>, %34, %cst_10 [1, 2] : vector<1x32x16xf32> to vector<1xf32>
    %36 = vector.shape_cast %35 : vector<1xf32> to vector<1x1x1xf32>
    %37 = vector.extract %36[0, 0, 0] : f32 from vector<1x1x1xf32>
    %38 = vector.broadcast %37 : f32 to vector<1x1xf32>
    %39 = tpu.iota {dimensions = array<i32: 0>} : vector<8x128xi32>
    %c0_i32_11 = arith.constant 0 : i32
    %40 = vector.broadcast %c0_i32_11 : i32 to vector<8x128xi32>
    %41 = arith.cmpi eq, %39, %40 : vector<8x128xi32>
    %c1_i32 = arith.constant 1 : i32
    %42 = vector.broadcast %c1_i32 : i32 to vector<8x128xi32>
    %43 = arith.cmpi eq, %39, %42 : vector<8x128xi32>
    %c2_i32 = arith.constant 2 : i32
    %44 = vector.broadcast %c2_i32 : i32 to vector<8x128xi32>
    %45 = arith.cmpi eq, %39, %44 : vector<8x128xi32>
    %cst_12 = arith.constant 0.000000e+00 : f32
    %46 = vector.shape_cast %38 : vector<1x1xf32> to vector<1x1xf32>
    %47 = vector.broadcast %46 : vector<1x1xf32> to vector<8x128xf32>
    %48 = vector.broadcast %cst_12 : f32 to vector<8x128xf32>
    %49 = arith.select %45, %47, %48 : vector<8x128xi1>, vector<8x128xf32>
    %50 = vector.shape_cast %31 : vector<1x1xf32> to vector<1x1xf32>
    %51 = vector.broadcast %50 : vector<1x1xf32> to vector<8x128xf32>
    %52 = arith.select %43, %51, %49 : vector<8x128xi1>, vector<8x128xf32>
    %53 = vector.shape_cast %25 : vector<1x1xf32> to vector<1x1xf32>
    %54 = vector.broadcast %53 : vector<1x1xf32> to vector<8x128xf32>
    %55 = arith.select %41, %54, %52 : vector<8x128xi1>, vector<8x128xf32>
    %c0_13 = arith.constant 0 : index
    %c0_14 = arith.constant 0 : index
    %56 = vector.load %arg4[%c0_13, %c0_14] : memref<8x128xf32, #tpu.memory_space<vmem>>, vector<8x128xf32>
    tpu.vector_store %arg4[%c0_13, %c0_14], %55 {strides = array<i32>} : memref<8x128xf32, #tpu.memory_space<vmem>>, vector<8x128xf32>,
    return
  }
  func.func @transform_0(%arg0: i32) -> (i32, i32) {
    %c0_i32 = arith.constant 0 : i32
    %c0_i32_0 = arith.constant 0 : i32
    return %arg0, %c0_i32 : i32, i32
  }
  func.func @transform_1(%arg0: i32) -> (i32, i32) {
    %c0_i32 = arith.constant 0 : i32
    %c0_i32_0 = arith.constant 0 : i32
    return %arg0, %c0_i32 : i32, i32
  }
  func.func @transform_2(%arg0: i32) -> (i32, i32) {
    %c0_i32 = arith.constant 0 : i32
    %c0_i32_0 = arith.constant 0 : i32
    return %arg0, %c0_i32 : i32, i32
  }
  func.func @transform_3(%arg0: i32) -> (i32, i32) {
    %c0_i32 = arith.constant 0 : i32
    %c0_i32_0 = arith.constant 0 : i32
    return %arg0, %c0_i32 : i32, i32
  }
}

</mosaic_0001>

<bundles_post_ra>
// kernel: tpu_custom_call.1
= control target key start
LH: loop header
LB: loop body
LE: loop exit
PB: predicated region body
PF: predicated region fallthrough
CT: control target
= control target key end

     0   :  { %vm82_vm0 = vcmask 130048   ;;  %v219_v6 = vmov 0.0   ;;  %s329_s0 = inlined_call_operand.vmem [shape: f32[32,16], index: 0, kind: input, shape index: {}]   ;;  %s330_s1 = inlined_call_operand.vmem [shape: f32[32,16], index: 1, kind: input, shape index: {}]   ;;  %s331_s2 = inlined_call_operand.vmem [shape: s32[32,16], index: 2, kind: input, shape index: {}]   ;;  %s332_s3 = inlined_call_operand.hbm [shape: f32[8,128], index: 3, kind: output, shape index: {}]  }
   0x1   :  { %v244_v0 = vld [vmem:[%s331_s2] sm:$0xff]  ;;  %v249_v1 = vld [vmem:[%s331_s2 + $0x8] sm:$0xff]  ;;  %v254_v2 = vld [vmem:[%s331_s2 + $0x10] sm:$0xff] }
   0x2   :  { %v259_v3 = vld [vmem:[%s331_s2 + $0x18] sm:$0xff]  ;;  %vm42_vm1 = vcmp.ne.s32.totalorder %v244_v0, 0  ;;  %vm43_vm2 = vcmp.ne.s32.totalorder %v249_v1, 0  ;;  %vm44_vm3 = vcmp.ne.s32.totalorder %v254_v2, 0  ;;  %v15_v4 = vld [vmem:[%s329_s0] sm:$0xff]  ;;  %v16_v5 = vld [vmem:[%s329_s0 + $0x8] sm:$0xff] }
   0x3   :  { %vm45_vm4 = vcmp.ne.s32.totalorder %v259_v3, 0  ;;  %v167_v7 = vsel %vm42_vm1, 1.0, %v219_v6  ;;  %v168_v8 = vsel %vm43_vm2, 1.0, %v219_v6  ;;  %v169_v9 = vsel %vm44_vm3, 1.0, %v219_v6  ;;  %v17_v10 = vld [vmem:[%s329_s0 + $0x10] sm:$0xff]  ;;  %v18_v11 = vld [vmem:[%s329_s0 + $0x18] sm:$0xff] }
   0x4   :  { %v170_v12 = vsel %vm45_vm4, 1.0, %v219_v6  ;;  %v127_v13 = vsel %vm82_vm0, %v167_v7, 0.0  ;;  %v128_v14 = vsel %vm82_vm0, %v168_v8, 0.0  ;;  %v130_v15 = vsel %vm82_vm0, %v169_v9, 0.0  ;;  %v19_v16 = vld [vmem:[%s330_s1] sm:$0xff]  ;;  %v20_v19 = vld [vmem:[%s330_s1 + $0x8] sm:$0xff] }
   0x5   :  { %v129_v17 = vadd.f32 %v128_v14, %v127_v13  ;;  %v132_v18 = vsel %vm82_vm0, %v170_v12, 0.0  ;;  %v21_v20 = vld [vmem:[%s330_s1 + $0x10] sm:$0xff]  ;;  %v50_v21 = vadd.f32 1e-07, %v15_v4  ;;  %v51_v22 = vadd.f32 1e-07, %v16_v5 }
   0x6   :  { %v52_v23 = vadd.f32 1e-07, %v17_v10  ;;  %v53_v24 = vadd.f32 1e-07, %v18_v11  ;;  %v22_v26 = vld [vmem:[%s330_s1 + $0x18] sm:$0xff] }
   0x7   :  { %v131_v25 = vadd.f32 %v130_v15, %v129_v17  ;;  %179 = vlog2.f32 %v50_v21  ;;  %v62_v27 = vadd.f32 1e-07, %v19_v16 }
   0x8   :  { %8 = vsyncpa [#allocation3], 0  ;;  %181 = vlog2.f32 %v51_v22  ;;  %v63_v28 = vadd.f32 1e-07, %v20_v19  ;;  %v64_v30 = vadd.f32 1e-07, %v21_v20 }
   0x9   :  { %v133_v29 = vadd.f32 %v132_v18, %v131_v25  ;;  %183 = vlog2.f32 %v52_v23  ;;  %v65_v31 = vadd.f32 1e-07, %v22_v26  ;;  %s220_s9 = smov [#allocation2]  }
   0xa   :  { %185 = vlog2.f32 %v53_v24  ;;  %s159_s10 = sshll.u32 %s220_s9, 4  ;;  %s160_s10 = int_to_ptr.vmem [resolvable:$true] %s159_s10 }
   0xb   :  { %134 = vadd.xlane.f32.xlu1 %v133_v29  ;;  %187 = vlog2.f32 %v62_v27  ;;  %s195_s11 = scalar_lea.vmem %s160_s10, 128  ;;  %p200_p1 = scmp.lt.s32.totalorder %s160_s10, %s160_s10 }
   0xc   :  { %189 = vlog2.f32 %v63_v28  ;;  %p196_p0 = scmp.ne.s32.totalorder %s160_s10, %s195_s11  ;;  %p201_p2 = scmp.lt.s32.totalorder %s195_s11, %s195_s11 }
   0xd   :  { %191 = vlog2.f32 %v64_v30 }
   0xe   :  { %193 = vlog2.f32 %v65_v31  ;;  %v23_v31 = vlaneseq  ;;  %p202_p3 = por %p201_p2, %p200_p1 }
  0x10   :  { %p203_p4 = pnand %p202_p3, %p196_p0 }
  0x11   :  { %v180_v32 = vpop.eup %179 }
  0x12   :  { %v182_v33 = vpop.eup %181  ;;  %v55_v36 = vmul.f32 0.6931472, %v180_v32  ;;  %v24_v32 = vshrl.u32 %v23_v31, 7 }
  0x13   :  { %v184_v34 = vpop.eup %183  ;;  %v57_v38 = vmul.f32 0.6931472, %v182_v33 }
  0x14   :  { %v186_v35 = vpop.eup %185  ;;  %v59_v40 = vmul.f32 0.6931472, %v184_v34  ;;  %vm145_vm5 = vcmp.eq.s32.totalorder %v24_v32, 2  ;;  %vm144_vm6 = vcmp.eq.s32.totalorder %v24_v32, 1  ;;  %vm143_vm7 = vcmp.eq.s32.totalorder %v24_v32, 0 }
  0x15   :  { %v188_v37 = vpop.eup %187  ;;  %v61_v43 = vmul.f32 0.6931472, %v186_v35 }
  0x16   :  { %v190_v39 = vpop.eup %189  ;;  %v67_v41 = vmul.f32 0.6931472, %v188_v37 }
  0x17   :  { %v192_v42 = vpop.eup %191  ;;  %v69_v44 = vmul.f32 0.6931472, %v190_v39 }
  0x18   :  { %v194_v45 = vpop.eup %193  ;;  %v71_v46 = vmul.f32 0.6931472, %v192_v42  ;;  %v74_v47 = vsub.f32 %v55_v36, %v67_v41 }
  0x19   :  { %v73_v48 = vmul.f32 0.6931472, %v194_v45  ;;  %v75_v49 = vsub.f32 %v57_v38, %v69_v44 }
  0x1a   :  { %v76_v50 = vsub.f32 %v59_v40, %v71_v46  ;;  %v78_v51 = vsel %vm42_vm1, %v74_v47, 0.0 }
  0x1b   :  { %v77_v52 = vsub.f32 %v61_v43, %v73_v48  ;;  %v79_v53 = vsel %vm43_vm2, %v75_v49, 0.0  ;;  %v83_v54 = vsel %vm82_vm0, %v78_v51, 0.0  ;;  %v99_v55 = vmul.f32 %v78_v51, %v78_v51 }
  0x1c   :  { %v80_v56 = vsel %vm44_vm3, %v76_v50, 0.0  ;;  %v84_v57 = vsel %vm82_vm0, %v79_v53, 0.0  ;;  %v100_v58 = vmul.f32 %v79_v53, %v79_v53 }
  0x1d   :  { %v81_v59 = vsel %vm45_vm4, %v77_v52, 0.0  ;;  %v85_v60 = vadd.f32 %v84_v57, %v83_v54  ;;  %v86_v61 = vsel %vm82_vm0, %v80_v56, 0.0  ;;  %v101_v62 = vmul.f32 %v80_v56, %v80_v56 }
  0x1e   :  { %v88_v63 = vsel %vm82_vm0, %v81_v59, 0.0  ;;  %v102_v0 = vmul.f32 %v81_v59, %v81_v59  ;;  %v103_v1 = vsel %vm82_vm0, %v99_v55, 0.0  ;;  %v104_v4 = vsel %vm82_vm0, %v100_v58, 0.0 }
  0x1f   :  { %v87_v5 = vadd.f32 %v86_v61, %v85_v60  ;;  %v105_v2 = vadd.f32 %v104_v4, %v103_v1  ;;  %v106_v6 = vsel %vm82_vm0, %v101_v62, 0.0 }
  0x20   :  { %v108_v7 = vsel %vm82_vm0, %v102_v0, 0.0 }
  0x21   :  { %v89_v8 = vadd.f32 %v88_v63, %v87_v5  ;;  %v107_v3 = vadd.f32 %v106_v6, %v105_v2 }
  0x23   :  { %90 = vadd.xlane.f32.xlu0 %v89_v8  ;;  %v109_v9 = vadd.f32 %v108_v7, %v107_v3 }
  0x27   :  { %110 = vadd.xlane.f32.xlu0 %v109_v9 }
  0x98   :  { %v135_v10 = vpop.xlane.xlu1 %134 }
  0x99   :  { %v136_v11 = vrot.slane %v135_v10, 4 }
  0x9b   :  { %v137_v12 = vadd.f32 %v136_v11, %v135_v10 }
  0x9d   :  { %v138_v16 = vrot.slane %v137_v12, 2 }
  0x9f   :  { %v139_v22 = vadd.f32 %v138_v16, %v137_v12 }
  0xa1   :  { %v140_v27 = vrot.slane %v139_v22, 1 }
  0xa3   :  { %v141_v30 = vadd.f32 %v140_v27, %v139_v22 }
  0xb0   :  { %v91_v13 = vpop.xlane.xlu0 %90 }
  0xb1   :  { %v92_v14 = vrot.slane %v91_v13, 4 }
  0xb3   :  { %v93_v15 = vadd.f32 %v92_v14, %v91_v13 }
  0xb4   :  { %v111_v17 = vpop.xlane.xlu0 %110 }
  0xb5   :  { %v94_v18 = vrot.slane %v93_v15, 2  ;;  %v112_v19 = vrot.slane %v111_v17, 4 }
  0xb7   :  { %v113_v20 = vadd.f32 %v112_v19, %v111_v17  ;;  %v95_v21 = vadd.f32 %v94_v18, %v93_v15 }
  0xb9   :  { %v114_v23 = vrot.slane %v113_v20, 2  ;;  %v96_v24 = vrot.slane %v95_v21, 1 }
  0xbb   :  { %v115_v25 = vadd.f32 %v114_v23, %v113_v20  ;;  %v97_v26 = vadd.f32 %v96_v24, %v95_v21 }
  0xbd   :  { %171 = vpush %v97_v26  ;;  %v116_v28 = vrot.slane %v115_v25, 1 }
  0xbf   :  { %v117_v29 = vadd.f32 %v116_v28, %v115_v25 }
  0xc1   :  { %173 = vpush %v117_v29 }
  0xc2   :  { %175 = vpush %v141_v30 }
  0xee   :  { %s172_s1 = spop %171 }
  0xef   :  { %v150_v36 = vstv %s172_s1 }
  0xf2   :  { %s174_s7 = spop %173 }
  0xf3   :  { %v148_v33 = vstv %s174_s7  ;;  %s176_s8 = spop %175 }
  0xf4   :  { %v146_v34 = vstv %s176_s8 }
  0xf5   :  { %v147_v35 = vsel %vm145_vm5, %v146_v34, 0.0 }
  0xf6   :  { %v149_v37 = vsel %vm144_vm6, %v148_v33, %v147_v35 }
  0xf7   :  { %v151_v38 = vsel %vm143_vm7, %v150_v36, %v149_v37 }
  0xf8   :  { %152 = vst [vmem:[#allocation2] sm:$0xff] %v151_v38 }
  0xf9   :  { %206 = shalt.err (!%p203_p4)
}
  0xfa   :  { %s207_s14 = scalar_lea.hbm %s332_s3, 128 }
  0xfb   :  { %p208_p5 = scmp.ne.s32.totalorder %s332_s3, %s207_s14  ;;  %p211_p6 = scmp.lt.u32.totalorder %s207_s14, %s332_s3 }
  0xfd   :  { %p213_p7 = pnand %p211_p6, %p208_p5 }
  0xff   :  { %216 = shalt.err (!%p213_p7)
}
 0x100   :  { %162 = dma.vmem_to_hbm [thread:$0]  %s160_s10, 128, %s332_s3, [#allocation3]  }
 0x101   :  { %217 = dma.done.wait [#allocation3], 128  }
 0x102   :  { %218 = vsyncadd [#allocation3], 4294967168 }
 0x103   :  { %166 = vsyncpa [#allocation3], 1 }

</bundles_post_ra>
